<compile_context>
chip_gen: v7x
topology: tpu7x:2x2x1
jax: 0.10.0
libtpu: 0.0.40
codegen_flags: <defaults>
</compile_context>

<pallas_src>
import functools

import jax
import jax.numpy as jnp
from jax import lax
from jax.experimental import pallas as pl
from jax.experimental.pallas import tpu as pltpu


def _loss_kernel(x_ref, t_ref,
                 acc_p_ref, acc_m_ref, acc_oh_ref, acc_nll_ref,
                 *, hw, tile):
    """One (image n, pixel-tile j) grid step.

    x_ref : (1, C, tile) logits           (classes on sublanes, pixels on lanes)
    t_ref : (1, 1, tile) int32 labels
    Lane-dense accumulators (resident across the inner pixel-tile axis):
      acc_p   += softmax probs
      acc_m   += probs * one_hot
      acc_oh  += one_hot
      acc_nll += one_hot * nll          (per-class NLL partial sums)
    """
    j = pl.program_id(1)

    @pl.when(j == 0)
    def _():
        acc_p_ref[...] = jnp.zeros_like(acc_p_ref)
        acc_m_ref[...] = jnp.zeros_like(acc_m_ref)
        acc_oh_ref[...] = jnp.zeros_like(acc_oh_ref)
        acc_nll_ref[...] = jnp.zeros_like(acc_nll_ref)

    logits = x_ref[0].astype(jnp.float32)           # (C, tile)
    tgt = t_ref[0]                                   # (1, tile) int32
    C = logits.shape[0]

    # validity mask for the padded ragged tail (hw, tile are static Python ints)
    lane = lax.broadcasted_iota(jnp.int32, (1, tile), 1)
    valid = (j * tile + lane) < hw                   # (1, tile) bool
    valid_f = valid.astype(jnp.float32)

    # numerically-stable softmax over the class (sublane) axis
    m = jnp.max(logits, axis=0, keepdims=True)       # (1, tile)
    e = jnp.exp(logits - m)
    s = jnp.sum(e, axis=0, keepdims=True)            # (1, tile)
    inv_s = pl.reciprocal(s, approx=False)           # EUP slot, frees VALU
    probas = e * inv_s                               # (C, tile)

    # masked one-hot (padded / out-of-range pixels -> all-zero column)
    cidx = lax.broadcasted_iota(jnp.int32, (C, tile), 0)
    one_hot = ((cidx == tgt) & valid).astype(jnp.float32)      # (C, tile)

    # nll_i = (m_i + log s_i) - logit[target_i]; no (C, tile) log-softmax array
    gathered = jnp.sum(one_hot * logits, axis=0, keepdims=True)  # (1, tile)
    nll = (m + jnp.log(s)) - gathered                            # (1, tile)

    acc_p_ref[0] += probas * valid_f
    acc_m_ref[0] += probas * one_hot
    acc_oh_ref[0] += one_hot
    acc_nll_ref[0] += one_hot * nll


@functools.partial(jax.jit, static_argnames=("tile_hw",))
def wce_generalized_dice_loss(inputs, targets, class_weights,
                              eps=1e-7, tile_hw=8192):
    """inputs: (N, C, H, W) logits; targets: (N, 1, H, W) integer labels."""
    N, C, H, W = inputs.shape
    HW = H * W

    # pixels-on-lanes layout straight from NCHW: free reshape, no transpose,
    # no dtype cast in the wrapper (cast happens after load inside the kernel).
    x = inputs.reshape(N, C, HW)
    t = targets.reshape(N, 1, HW).astype(jnp.int32)

    # lane-dense pixel tile; pad the ragged tail (masked inside the kernel)
    hw_lane = ((HW + 127) // 128) * 128
    tile = max(128, min((tile_hw // 128) * 128, hw_lane))
    hw_pad = ((HW + tile - 1) // tile) * tile
    if hw_pad != HW:
        x = jnp.pad(x, ((0, 0), (0, 0), (0, hw_pad - HW)))
        t = jnp.pad(t, ((0, 0), (0, 0), (0, hw_pad - HW)))

    grid = (N, hw_pad // tile)
    kernel = functools.partial(_loss_kernel, hw=HW, tile=tile)

    acc_shape = jax.ShapeDtypeStruct((N, C, tile), jnp.float32)
    acc_spec = pl.BlockSpec((1, C, tile), lambda n, j: (n, 0, 0))

    acc_p, acc_m, acc_oh, acc_nll = pl.pallas_call(
        kernel,
        out_shape=(acc_shape,) * 4,
        grid_spec=pltpu.PrefetchScalarGridSpec(
            num_scalar_prefetch=0,
            grid=grid,
            in_specs=[
                pl.BlockSpec((1, C, tile), lambda n, j: (n, 0, j)),
                pl.BlockSpec((1, 1, tile), lambda n, j: (n, 0, j)),
            ],
            out_specs=[acc_spec] * 4,
        ),
        compiler_params=pltpu.CompilerParams(
            # batch axis can be split across TensorCores (v7x megacore);
            # the pixel-tile axis carries the resident accumulators.
            dimension_semantics=("parallel", "arbitrary")),
    )(x, t)

    # final tiny reductions + class-weight contraction, once, in the wrapper
    sum_p = jnp.sum(acc_p, axis=(0, 2))       # (C,) sum of softmax probs
    sum_m = jnp.sum(acc_m, axis=(0, 2))       # (C,) sum of probs * one_hot
    sum_oh = jnp.sum(acc_oh, axis=(0, 2))     # (C,) pixel count per class
    nll_c = jnp.sum(acc_nll, axis=(0, 2))     # (C,) per-class NLL sums

    cw = class_weights.astype(jnp.float32)
    P = N * HW
    # sum over (0,2,3) of the per-class weight map == class_weights[c] * N*H*W
    sum_w = cw * jnp.float32(P)
    intersection = 2.0 * (sum_w ** 2) * sum_m + eps
    cardinality = (sum_w ** 2) * (sum_p + sum_oh) + eps
    dice_loss = 1.0 - jnp.mean(intersection / cardinality)

    # weighted CE with reduction='mean' (PyTorch semantics with class weights)
    ce = jnp.sum(cw * nll_c) / jnp.sum(cw * sum_oh)
    return dice_loss * 0.6 + ce * 0.4


def _reference(inputs, targets, class_weights, eps=1e-7):
    """Pure-JAX replica of the PyTorch forward for a correctness check."""
    N, C, H, W = inputs.shape
    t = jnp.squeeze(targets, axis=1).astype(jnp.int32)
    probas = jax.nn.softmax(inputs, axis=1)
    oh = jnp.transpose(jax.nn.one_hot(t, C, dtype=jnp.float32), (0, 3, 1, 2))
    w = jnp.broadcast_to(class_weights.reshape(1, C, 1, 1), inputs.shape)
    sum_w = jnp.sum(w, axis=(0, 2, 3))
    inter = 2.0 * sum_w ** 2 * jnp.sum(probas * oh, axis=(0, 2, 3)) + eps
    card = sum_w ** 2 * (jnp.sum(probas, axis=(0, 2, 3))
                         + jnp.sum(oh, axis=(0, 2, 3))) + eps
    dice = 1.0 - jnp.mean(inter / card)
    logp = jax.nn.log_softmax(inputs, axis=1)
    nll = -jnp.take_along_axis(logp, t[:, None], axis=1)[:, 0]
    wt = class_weights[t]
    ce = jnp.sum(wt * nll) / jnp.sum(wt)
    return dice * 0.6 + ce * 0.4


if __name__ == "__main__":
    key = jax.random.PRNGKey(0)
    # deterministic "parameters" (class_weights from the module __init__)
    class_weights = jnp.array([0.1, 0.3, 0.25, 0.35], dtype=jnp.float32)

    # case 1: nice shapes
    N, C, H, W = 2, 4, 16, 16
    k1, k2, k3, k4 = jax.random.split(key, 4)
    inputs = jax.random.normal(k1, (N, C, H, W), dtype=jnp.float32)
    targets = jax.random.randint(k2, (N, 1, H, W), 0, C, dtype=jnp.int32)

    loss = wce_generalized_dice_loss(inputs, targets, class_weights)
    loss = jax.block_until_ready(loss)
    ref = _reference(inputs, targets, class_weights)
    assert jnp.allclose(loss, ref, atol=1e-5, rtol=1e-5), (loss, ref)

    # case 2: ragged spatial size (exercises the masked padded tail)
    H2, W2 = 10, 10
    inputs2 = jax.random.normal(k3, (N, C, H2, W2), dtype=jnp.float32)
    targets2 = jax.random.randint(k4, (N, 1, H2, W2), 0, C, dtype=jnp.int32)

    loss2 = wce_generalized_dice_loss(inputs2, targets2, class_weights)
    loss2 = jax.block_until_ready(loss2)
    ref2 = _reference(inputs2, targets2, class_weights)
    assert jnp.allclose(loss2, ref2, atol=1e-5, rtol=1e-5), (loss2, ref2)

    print("KERNEL_OK")
</pallas_src>

<mosaic_0001>
module attributes {stable_mosaic.version = 11 : i64} {
  func.func @_loss_kernel(%arg0: i32, %arg1: i32, %arg2: memref<1x4x256xf32, #tpu.memory_space<vmem>>, %arg3: memref<1x1x256xi32, #tpu.memory_space<vmem>>, %arg4: memref<1x4x256xf32, #tpu.memory_space<vmem>>, %arg5: memref<1x4x256xf32, #tpu.memory_space<vmem>>, %arg6: memref<1x4x256xf32, #tpu.memory_space<vmem>>, %arg7: memref<1x4x256xf32, #tpu.memory_space<vmem>>) attributes {dimension_semantics = [#tpu.dimension_semantics<parallel>, #tpu.dimension_semantics<arbitrary>], iteration_bounds = array<i64: 2, 1>, scalar_prefetch = 0 : i64, scratch_operands = 0 : i64, tpu.core_type = #tpu.core_type<tc>, window_params = [{transform_indices = @transform_0, window_bounds = array<i64: 1, 4, 256>}, {transform_indices = @transform_1, window_bounds = array<i64: 1, 1, 256>}, {transform_indices = @transform_2, window_bounds = array<i64: 1, 4, 256>}, {transform_indices = @transform_3, window_bounds = array<i64: 1, 4, 256>}, {transform_indices = @transform_4, window_bounds = array<i64: 1, 4, 256>}, {transform_indices = @transform_5, window_bounds = array<i64: 1, 4, 256>}]} {
    %c0_i32 = arith.constant 0 : i32
    %0 = arith.cmpi eq, %arg1, %c0_i32 : i32
    %1 = arith.extui %0 : i1 to i32
    %c0_i32_0 = arith.constant 0 : i32
    %2 = arith.cmpi ne, %1, %c0_i32_0 : i32
    scf.if %2 {
      %cst_33 = arith.constant 0.000000e+00 : f32
      %67 = vector.broadcast %cst_33 : f32 to vector<1x4x256xf32>
      %c0_34 = arith.constant 0 : index
      %c0_35 = arith.constant 0 : index
      %c0_36 = arith.constant 0 : index
      %68 = vector.load %arg4[%c0_34, %c0_35, %c0_36] : memref<1x4x256xf32, #tpu.memory_space<vmem>>, vector<1x4x256xf32>
      tpu.vector_store %arg4[%c0_34, %c0_35, %c0_36], %67 {strides = array<i32>} : memref<1x4x256xf32, #tpu.memory_space<vmem>>, vector<1x4x256xf32>,
      %cst_37 = arith.constant 0.000000e+00 : f32
      %69 = vector.broadcast %cst_37 : f32 to vector<1x4x256xf32>
      %c0_38 = arith.constant 0 : index
      %c0_39 = arith.constant 0 : index
      %c0_40 = arith.constant 0 : index
      %70 = vector.load %arg5[%c0_38, %c0_39, %c0_40] : memref<1x4x256xf32, #tpu.memory_space<vmem>>, vector<1x4x256xf32>
      tpu.vector_store %arg5[%c0_38, %c0_39, %c0_40], %69 {strides = array<i32>} : memref<1x4x256xf32, #tpu.memory_space<vmem>>, vector<1x4x256xf32>,
      %cst_41 = arith.constant 0.000000e+00 : f32
      %71 = vector.broadcast %cst_41 : f32 to vector<1x4x256xf32>
      %c0_42 = arith.constant 0 : index
      %c0_43 = arith.constant 0 : index
      %c0_44 = arith.constant 0 : index
      %72 = vector.load %arg6[%c0_42, %c0_43, %c0_44] : memref<1x4x256xf32, #tpu.memory_space<vmem>>, vector<1x4x256xf32>
      tpu.vector_store %arg6[%c0_42, %c0_43, %c0_44], %71 {strides = array<i32>} : memref<1x4x256xf32, #tpu.memory_space<vmem>>, vector<1x4x256xf32>,
      %cst_45 = arith.constant 0.000000e+00 : f32
      %73 = vector.broadcast %cst_45 : f32 to vector<1x4x256xf32>
      %c0_46 = arith.constant 0 : index
      %c0_47 = arith.constant 0 : index
      %c0_48 = arith.constant 0 : index
      %74 = vector.load %arg7[%c0_46, %c0_47, %c0_48] : memref<1x4x256xf32, #tpu.memory_space<vmem>>, vector<1x4x256xf32>
      tpu.vector_store %arg7[%c0_46, %c0_47, %c0_48], %73 {strides = array<i32>} : memref<1x4x256xf32, #tpu.memory_space<vmem>>, vector<1x4x256xf32>,
    } else {
    }
    %c0 = arith.constant 0 : index
    %c0_1 = arith.constant 0 : index
    %c0_2 = arith.constant 0 : index
    %3 = vector.load %arg2[%c0, %c0_1, %c0_2] : memref<1x4x256xf32, #tpu.memory_space<vmem>>, vector<1x4x256xf32>
    %4 = vector.shape_cast %3 : vector<1x4x256xf32> to vector<4x256xf32>
    %c0_3 = arith.constant 0 : index
    %c0_4 = arith.constant 0 : index
    %c0_5 = arith.constant 0 : index
    %5 = vector.load %arg3[%c0_3, %c0_4, %c0_5] : memref<1x1x256xi32, #tpu.memory_space<vmem>>, vector<1x1x256xi32>
    %6 = vector.shape_cast %5 : vector<1x1x256xi32> to vector<1x256xi32>
    %7 = tpu.iota {dimensions = array<i32: 1>} : vector<1x256xi32>
    %c256_i32 = arith.constant 256 : i32
    %8 = arith.muli %arg1, %c256_i32 : i32
    %9 = vector.broadcast %8 : i32 to vector<1x256xi32>
    %10 = arith.addi %9, %7 : vector<1x256xi32>
    %c256_i32_6 = arith.constant 256 : i32
    %11 = vector.broadcast %c256_i32_6 : i32 to vector<1x256xi32>
    %12 = arith.cmpi slt, %10, %11 : vector<1x256xi32>
    %13 = arith.extui %12 : vector<1x256xi1> to vector<1x256xi32>
    %14 = arith.sitofp %13 : vector<1x256xi32> to vector<1x256xf32>
    %cst = arith.constant dense<0xFF800000> : vector<256xf32>
    %15 = vector.multi_reduction <maximumf>, %4, %cst [0] : vector<4x256xf32> to vector<256xf32>
    %16 = vector.shape_cast %15 : vector<256xf32> to vector<1x256xf32>
    %17 = vector.broadcast %16 : vector<1x256xf32> to vector<4x256xf32>
    %18 = arith.subf %4, %17 : vector<4x256xf32>
    %19 = math.exp %18 : vector<4x256xf32>
    %cst_7 = arith.constant dense<0.000000e+00> : vector<256xf32>
    %20 = vector.multi_reduction <add>, %19, %cst_7 [0] : vector<4x256xf32> to vector<256xf32>
    %21 = vector.shape_cast %20 : vector<256xf32> to vector<1x256xf32>
    %22 = tpu.reciprocal %21 : vector<1x256xf32> -> vector<1x256xf32>
    %23 = vector.broadcast %22 : vector<1x256xf32> to vector<4x256xf32>
    %24 = arith.mulf %19, %23 : vector<4x256xf32>
    %25 = tpu.iota {dimensions = array<i32: 0>} : vector<4x256xi32>
    %26 = vector.broadcast %6 : vector<1x256xi32> to vector<4x256xi32>
    %27 = arith.cmpi eq, %25, %26 : vector<4x256xi32>
    %28 = vector.broadcast %12 : vector<1x256xi1> to vector<4x256xi1>
    %29 = arith.andi %27, %28 : vector<4x256xi1>
    %30 = arith.extui %29 : vector<4x256xi1> to vector<4x256xi32>
    %31 = arith.sitofp %30 : vector<4x256xi32> to vector<4x256xf32>
    %32 = arith.mulf %31, %4 : vector<4x256xf32>
    %cst_8 = arith.constant dense<0.000000e+00> : vector<256xf32>
    %33 = vector.multi_reduction <add>, %32, %cst_8 [0] : vector<4x256xf32> to vector<256xf32>
    %34 = vector.shape_cast %33 : vector<256xf32> to vector<1x256xf32>
    %35 = math.log %21 : vector<1x256xf32>
    %36 = arith.addf %16, %35 : vector<1x256xf32>
    %37 = arith.subf %36, %34 : vector<1x256xf32>
    %c0_9 = arith.constant 0 : index
    %c0_10 = arith.constant 0 : index
    %c0_11 = arith.constant 0 : index
    %38 = vector.load %arg4[%c0_9, %c0_10, %c0_11] : memref<1x4x256xf32, #tpu.memory_space<vmem>>, vector<1x4x256xf32>
    %39 = vector.shape_cast %38 : vector<1x4x256xf32> to vector<4x256xf32>
    %40 = vector.broadcast %14 : vector<1x256xf32> to vector<4x256xf32>
    %41 = arith.mulf %24, %40 : vector<4x256xf32>
    %42 = arith.addf %39, %41 : vector<4x256xf32>
    %c0_12 = arith.constant 0 : index
    %c0_13 = arith.constant 0 : index
    %c0_14 = arith.constant 0 : index
    %43 = vector.load %arg4[%c0_12, %c0_13, %c0_14] : memref<1x4x256xf32, #tpu.memory_space<vmem>>, vector<1x4x256xf32>
    %44 = vector.shape_cast %43 : vector<1x4x256xf32> to vector<4x256xf32>
    %45 = vector.shape_cast %42 : vector<4x256xf32> to vector<1x4x256xf32>
    tpu.vector_store %arg4[%c0_12, %c0_13, %c0_14], %45 {strides = array<i32>} : memref<1x4x256xf32, #tpu.memory_space<vmem>>, vector<1x4x256xf32>,
    %c0_15 = arith.constant 0 : index
    %c0_16 = arith.constant 0 : index
    %c0_17 = arith.constant 0 : index
    %46 = vector.load %arg5[%c0_15, %c0_16, %c0_17] : memref<1x4x256xf32, #tpu.memory_space<vmem>>, vector<1x4x256xf32>
    %47 = vector.shape_cast %46 : vector<1x4x256xf32> to vector<4x256xf32>
    %48 = arith.mulf %24, %31 : vector<4x256xf32>
    %49 = arith.addf %47, %48 : vector<4x256xf32>
    %c0_18 = arith.constant 0 : index
    %c0_19 = arith.constant 0 : index
    %c0_20 = arith.constant 0 : index
    %50 = vector.load %arg5[%c0_18, %c0_19, %c0_20] : memref<1x4x256xf32, #tpu.memory_space<vmem>>, vector<1x4x256xf32>
    %51 = vector.shape_cast %50 : vector<1x4x256xf32> to vector<4x256xf32>
    %52 = vector.shape_cast %49 : vector<4x256xf32> to vector<1x4x256xf32>
    tpu.vector_store %arg5[%c0_18, %c0_19, %c0_20], %52 {strides = array<i32>} : memref<1x4x256xf32, #tpu.memory_space<vmem>>, vector<1x4x256xf32>,
    %c0_21 = arith.constant 0 : index
    %c0_22 = arith.constant 0 : index
    %c0_23 = arith.constant 0 : index
    %53 = vector.load %arg6[%c0_21, %c0_22, %c0_23] : memref<1x4x256xf32, #tpu.memory_space<vmem>>, vector<1x4x256xf32>
    %54 = vector.shape_cast %53 : vector<1x4x256xf32> to vector<4x256xf32>
    %55 = arith.addf %54, %31 : vector<4x256xf32>
    %c0_24 = arith.constant 0 : index
    %c0_25 = arith.constant 0 : index
    %c0_26 = arith.constant 0 : index
    %56 = vector.load %arg6[%c0_24, %c0_25, %c0_26] : memref<1x4x256xf32, #tpu.memory_space<vmem>>, vector<1x4x256xf32>
    %57 = vector.shape_cast %56 : vector<1x4x256xf32> to vector<4x256xf32>
    %58 = vector.shape_cast %55 : vector<4x256xf32> to vector<1x4x256xf32>
    tpu.vector_store %arg6[%c0_24, %c0_25, %c0_26], %58 {strides = array<i32>} : memref<1x4x256xf32, #tpu.memory_space<vmem>>, vector<1x4x256xf32>,
    %c0_27 = arith.constant 0 : index
    %c0_28 = arith.constant 0 : index
    %c0_29 = arith.constant 0 : index
    %59 = vector.load %arg7[%c0_27, %c0_28, %c0_29] : memref<1x4x256xf32, #tpu.memory_space<vmem>>, vector<1x4x256xf32>
    %60 = vector.shape_cast %59 : vector<1x4x256xf32> to vector<4x256xf32>
    %61 = vector.broadcast %37 : vector<1x256xf32> to vector<4x256xf32>
    %62 = arith.mulf %31, %61 : vector<4x256xf32>
    %63 = arith.addf %60, %62 : vector<4x256xf32>
    %c0_30 = arith.constant 0 : index
    %c0_31 = arith.constant 0 : index
    %c0_32 = arith.constant 0 : index
    %64 = vector.load %arg7[%c0_30, %c0_31, %c0_32] : memref<1x4x256xf32, #tpu.memory_space<vmem>>, vector<1x4x256xf32>
    %65 = vector.shape_cast %64 : vector<1x4x256xf32> to vector<4x256xf32>
    %66 = vector.shape_cast %63 : vector<4x256xf32> to vector<1x4x256xf32>
    tpu.vector_store %arg7[%c0_30, %c0_31, %c0_32], %66 {strides = array<i32>} : memref<1x4x256xf32, #tpu.memory_space<vmem>>, vector<1x4x256xf32>,
    return
  }
  func.func @transform_0(%arg0: i32, %arg1: i32) -> (i32, i32, i32) {
    %c0_i32 = arith.constant 0 : i32
    %c0_i32_0 = arith.constant 0 : i32
    return %arg0, %c0_i32, %arg1 : i32, i32, i32
  }
  func.func @transform_1(%arg0: i32, %arg1: i32) -> (i32, i32, i32) {
    %c0_i32 = arith.constant 0 : i32
    %c0_i32_0 = arith.constant 0 : i32
    return %arg0, %c0_i32, %arg1 : i32, i32, i32
  }
  func.func @transform_2(%arg0: i32, %arg1: i32) -> (i32, i32, i32) {
    %c0_i32 = arith.constant 0 : i32
    %c0_i32_0 = arith.constant 0 : i32
    %c0_i32_1 = arith.constant 0 : i32
    return %arg0, %c0_i32, %c0_i32_0 : i32, i32, i32
  }
  func.func @transform_3(%arg0: i32, %arg1: i32) -> (i32, i32, i32) {
    %c0_i32 = arith.constant 0 : i32
    %c0_i32_0 = arith.constant 0 : i32
    %c0_i32_1 = arith.constant 0 : i32
    return %arg0, %c0_i32, %c0_i32_0 : i32, i32, i32
  }
  func.func @transform_4(%arg0: i32, %arg1: i32) -> (i32, i32, i32) {
    %c0_i32 = arith.constant 0 : i32
    %c0_i32_0 = arith.constant 0 : i32
    %c0_i32_1 = arith.constant 0 : i32
    return %arg0, %c0_i32, %c0_i32_0 : i32, i32, i32
  }
  func.func @transform_5(%arg0: i32, %arg1: i32) -> (i32, i32, i32) {
    %c0_i32 = arith.constant 0 : i32
    %c0_i32_0 = arith.constant 0 : i32
    %c0_i32_1 = arith.constant 0 : i32
    return %arg0, %c0_i32, %c0_i32_0 : i32, i32, i32
  }
}

</mosaic_0001>

<bundles_post_ra>
// kernel: wce_generalized_dice_loss.1
= control target key start
LH: loop header
LB: loop body
LE: loop exit
PB: predicated region body
PF: predicated region fallthrough
CT: control target
= control target key end

     0   :  { %s768_s18 = smov 0   ;;  %s770_s19 = smov 0   ;;  %s840_s0 = inlined_call_operand.vmem [shape: f32[2,4,256], index: 0, kind: input, shape index: {}]   ;;  %s841_s1 = inlined_call_operand.vmem [shape: s32[2,1,256], index: 1, kind: input, shape index: {}]   ;;  %s842_s2 = inlined_call_operand.vmem [shape: f32[2,4,256], index: 2, kind: output, shape index: {0}]   ;;  %s843_s3 = inlined_call_operand.vmem [shape: f32[2,4,256], index: 3, kind: output, shape index: {1}]   ;;  %s844_s4 = inlined_call_operand.vmem [shape: f32[2,4,256], index: 4, kind: output, shape index: {2}]   ;;  %s845_s5 = inlined_call_operand.vmem [shape: f32[2,4,256], index: 5, kind: output, shape index: {3}]  }
   0x1   :  { %s772_s20 = smov 0  }
   0x2 LB: > { %s28_s21 = sadd.s32 1, %s730_s19  ;;  %p654_p0 = scmp.ge.s32.totalorder %s734_s20, 1  ;;  %s734_s20 = sphi %s772_s20, %s16_s20   ;;  %s730_s19 = sphi %s770_s19, %s847_s19   ;;  %s726_s18 = sphi %s768_s18, %s846_s18  }
   0x3   : > { %p30_p1 = scmp.ge.s32.totalorder %s28_s21, 2  ;;  %p229_p2 = scmp.lt.s32.totalorder %s734_s20, 3 }
   0x5   : > { %s849_s21 = smov (%p30_p1, %s28_s21), 0  ;;  %p230_p3 = pnand %p654_p0, %p229_p2 }
   0x6   : > { %p285_p4 = scmp.lt.s32.totalorder (!%p230_p3), %s726_s18, 1  ;;  %v395_v0 = vlaneseq (!%p230_p3)  ;;  %vm349_vm0 = vcmask (!%p230_p3), 1043456   ;;  %v736_v14 = vmov (!%p230_p3), 0.0  }
   0x7   : > { %233 = sbr.rel (%p230_p3) target bundleno = 88 (0x58), region = 28 }
   0x8   : > { %v396_v1 = vshrl.u32 (!%p230_p3), %v395_v0, 7 }
   0xa   : > { %v399_v2 = vsub.s32 (!%p230_p3), 0, %v396_v1  ;;  %v403_v3 = vsub.s32 (!%p230_p3), 1, %v396_v1 }
   0xe   : > { %s851_s18 = smov (!%p285_p4, %s726_s18), 1 }
   0xf   : > { %s786_s22 = sshll.u32 %s851_s18, 3  ;;  %s657_s23 = sshll.u32 %s851_s18, 1 }
  0x10   : > { %s292_s26 = scalar_lea.vmem %s840_s0, %s786_s22  ;;  %s301_s29 = scalar_lea.vmem %s841_s1, %s657_s23 }
  0x11   : > { %v331_v4 = vld [vmem:[%s292_s26] sm:$0xff]  ;;  %s317_s7 = scalar_lea.vmem %s844_s4, %s786_s22  ;;  %s307_s10 = scalar_lea.vmem %s842_s2, %s786_s22 }
  0x12   : > { %v332_v5 = vld [vmem:[%s301_s29] sm:$0x3]  ;;  %v347_v6 = vcombine.high %v331_v4, %v331_v4  ;;  %v350_v7 = vsel %vm349_vm0, %v331_v4, -inf  ;;  %s312_s13 = scalar_lea.vmem %s843_s3, %s786_s22  ;;  %s322_s16 = scalar_lea.vmem %s845_s5, %s786_s22 }
  0x13   : > { %v400_v8 = vrot.slane %v332_v5, %v399_v2  ;;  %v404_v9 = vrot.slane %v332_v5, %v403_v3  ;;  %v351_v10 = vrot.slane %v350_v7, 4  ;;  %v737_v3 = vmov 1.0  }
  0x14   : > { %v357_v11 = vsel %vm349_vm0, %v347_v6, -inf }
  0x15   : > { %vm405_vm1 = vcmp.eq.s32.totalorder %v396_v1, %v400_v8  ;;  %vm406_vm2 = vcmp.eq.s32.totalorder %v396_v1, %v404_v9  ;;  %v352_v12 = vmax.f32 %v350_v7, %v351_v10  ;;  %v358_v13 = vrot.slane %v357_v11, 4 }
  0x16   : > { %v797_v15 = vsel %vm405_vm1, 1.0, %v736_v14  ;;  %v799_v16 = vsel %vm406_vm2, 1.0, %v736_v14 }
  0x17   : > { %v803_v17 = vcombine.low %v797_v15, %v799_v16  ;;  %v353_v18 = vrot.slane %v352_v12, 2  ;;  %v359_v19 = vmax.f32 %v357_v11, %v358_v13  ;;  %v415_v30 = vmul.f32 %v797_v15, %v331_v4 }
  0x18   : > { %v416_v34 = vmul.f32 %v799_v16, %v347_v6 }
  0x19   : > { %v354_v20 = vmax.f32 %v352_v12, %v353_v18  ;;  %v360_v21 = vrot.slane %v359_v19, 2  ;;  %457 = vst [vmem:[%s317_s7] sm:$0xff] %v803_v17  ;;  %v417_v37 = vsel %vm349_vm0, %v415_v30, 0.0 }
  0x1a   : > { %v424_v40 = vsel %vm349_vm0, %v416_v34, 0.0  ;;  %v418_v43 = vrot.slane %v417_v37, 4 }
  0x1b   : > { %v355_v22 = vrot.slane %v354_v20, 1  ;;  %v361_v23 = vmax.f32 %v359_v19, %v360_v21  ;;  %v425_v46 = vrot.slane %v424_v40, 4 }
  0x1c   : > { %v419_v49 = vadd.f32 %v418_v43, %v417_v37 }
  0x1d   : > { %v356_v24 = vmax.f32 %v354_v20, %v355_v22  ;;  %v362_v25 = vrot.slane %v361_v23, 1  ;;  %v426_v52 = vadd.f32 %v425_v46, %v424_v40 }
  0x1e   : > { %v420_v54 = vrot.slane %v419_v49, 2 }
  0x1f   : > { %v363_v26 = vmax.f32 %v361_v23, %v362_v25  ;;  %v427_v55 = vrot.slane %v426_v52, 2 }
  0x20   : > { %v421_v56 = vadd.f32 %v420_v54, %v419_v49 }
  0x21   : > { %v366_v27 = vcombine.low %v356_v24, %v363_v26  ;;  %v428_v57 = vadd.f32 %v427_v55, %v426_v52 }
  0x22   : > { %v422_v58 = vrot.slane %v421_v56, 1 }
  0x23   : > { %v368_v28 = vsub.f32 %v331_v4, %v366_v27  ;;  %v429_v60 = vrot.slane %v428_v57, 1  ;;  %v442_v4 = vcombine.low %v737_v3, %v737_v3 }
  0x24   : > { %v423_v63 = vadd.f32 %v422_v58, %v421_v56 }
  0x25   : > { %v369_v29 = vmul.f32 1.442695, %v368_v28  ;;  %v430_v5 = vadd.f32 %v429_v60, %v428_v57 }
  0x27   : > { %702 = vpow2.f32 %v369_v29 }
  0x31   : > { %v703_v31 = vpop.eup %702 }
  0x32   : > { %v372_v32 = vcombine.high %v703_v31, %v703_v31  ;;  %v374_v33 = vsel %vm349_vm0, %v703_v31, 0.0 }
  0x33   : > { %v375_v35 = vrot.slane %v374_v33, 4 }
  0x34   : > { %v381_v36 = vsel %vm349_vm0, %v372_v32, 0.0 }
  0x35   : > { %v376_v38 = vadd.f32 %v375_v35, %v374_v33  ;;  %v382_v39 = vrot.slane %v381_v36, 4 }
  0x37   : > { %v377_v41 = vrot.slane %v376_v38, 2  ;;  %v383_v42 = vadd.f32 %v382_v39, %v381_v36 }
  0x39   : > { %v378_v44 = vadd.f32 %v377_v41, %v376_v38  ;;  %v384_v45 = vrot.slane %v383_v42, 2 }
  0x3b   : > { %v379_v47 = vrot.slane %v378_v44, 1  ;;  %v385_v48 = vadd.f32 %v384_v45, %v383_v42 }
  0x3d   : > { %v380_v50 = vadd.f32 %v379_v47, %v378_v44  ;;  %v386_v51 = vrot.slane %v385_v48, 1 }
  0x3f   : > { %v387_v53 = vadd.f32 %v386_v51, %v385_v48  ;;  %704 = vrcp.f32 %v380_v50 }
  0x40   : > { %706 = vlog2.f32 %v380_v50 }
  0x41   : > { %708 = vrcp.f32 %v387_v53 }
  0x42   : > { %710 = vlog2.f32 %v387_v53 }
  0x49   : > { %v705_v59 = vpop.eup %704 }
  0x4a   : > { %v707_v61 = vpop.eup %706 }
  0x4b   : > { %v709_v62 = vpop.eup %708  ;;  %v432_v0 = vmul.f32 0.6931472, %v707_v61 }
  0x4c   : > { %v711_v1 = vpop.eup %710  ;;  %v392_v2 = vcombine.low %v705_v59, %v709_v62 }
  0x4d   : > { %v434_v6 = vmul.f32 0.6931472, %v711_v1  ;;  %v435_v7 = vadd.f32 %v432_v0, %v356_v24 }
  0x4e   : > { %v394_v8 = vmul.f32 %v703_v31, %v392_v2 }
  0x4f   : > { %v436_v9 = vadd.f32 %v434_v6, %v363_v26  ;;  %v437_v10 = vsub.f32 %v435_v7, %v423_v63 }
  0x50   : > { %v444_v11 = vmul.f32 %v442_v4, %v394_v8  ;;  %v452_v12 = vmul.f32 %v803_v17, %v394_v8 }
  0x51   : > { %v438_v13 = vsub.f32 %v436_v9, %v430_v5  ;;  %v459_v14 = vmul.f32 %v797_v15, %v437_v10 }
  0x52   : > { %446 = vst [vmem:[%s307_s10] sm:$0xff] %v444_v11  ;;  %454 = vst [vmem:[%s312_s13] sm:$0xff] %v452_v12 }
  0x53   : > { %v460_v18 = vmul.f32 %v799_v16, %v438_v13 }
  0x55   : > { %v463_v19 = vcombine.low %v459_v14, %v460_v18 }
  0x57   : > { %466 = vst [vmem:[%s322_s16] sm:$0xff] %v463_v19 }
  0x58 PF: > { %s16_s20 = sadd.s32 1, %s734_s20   ;;  %s846_s18 = smov %s730_s19 }
  0x59   : > { %p13_p5 = scmp.ge.s32.totalorder %s16_s20, 4   ;;  %s847_s19 = smov %s849_s21 }
  0x5b   :  { %15 = sbr.rel (!%p13_p5) target bundleno = 2 (0x2), region = 101 }

</bundles_post_ra>
